<compile_context>
chip_gen: v6e
topology: v6e:2x2x1
jax: 0.10.0
libtpu: 0.0.40
codegen_flags: <defaults>
</compile_context>

<pallas_src>
import math

import jax
import jax.numpy as jnp
from jax import lax
from jax.experimental import pallas as pl
from jax.experimental.pallas import tpu as pltpu


def _pick_tile(s, target):
    """Largest multiple of 128 that divides s and is <= target; else full s.

    Keeps the last block dim of channel-major (N, C, S) blocks either
    128-aligned (lane-dense, unmasked stores) or equal to the full extent,
    which also satisfies the (8, 128) BlockSpec divisibility rule.
    """
    if s <= target:
        return s
    t = (target // 128) * 128
    while t >= 128:
        if s % t == 0:
            return t
        t -= 128
    return s


# ---------------------------------------------------------------------------
# Stage 1: fused QKV projection.
# ---------------------------------------------------------------------------
def _qkv_proj_kernel(x_ref, w_ref, b_ref, q_ref, k_ref, v_ref):
    # x_ref: (ts, C) bf16 tokens        w_ref: (C, 3C) bf16 (Q cols pre-scaled)
    # b_ref: (1, 3C) f32                q/k/v_ref: (ts, C) bf16 outputs
    c = q_ref.shape[-1]
    qkv = jnp.dot(x_ref[...], w_ref[...],
                  preferred_element_type=jnp.float32) + b_ref[...]
    q_ref[...] = qkv[:, :c].astype(q_ref.dtype)
    k_ref[...] = qkv[:, c:2 * c].astype(k_ref.dtype)
    v_ref[...] = qkv[:, 2 * c:].astype(v_ref.dtype)


# ---------------------------------------------------------------------------
# Stage 2: flash attention + fused output projection + residual add.
# ---------------------------------------------------------------------------
def _flash_attn_kernel(q_ref, k_ref, v_ref, wo_ref, bo_ref, xres_ref, out_ref,
                       m_sc, l_sc, acc_sc):
    kv = pl.program_id(2)

    @pl.when(kv == 0)
    def _init():
        m_sc[...] = jnp.full_like(m_sc, -jnp.inf)
        l_sc[...] = jnp.zeros_like(l_sc)
        acc_sc[...] = jnp.zeros_like(acc_sc)

    # scores (tq, tk): contract the channel axis of q and k (bf16 in, f32 acc).
    # q is already scaled by 1/sqrt(C) (folded into the projection weights).
    s = lax.dot_general(q_ref[...], k_ref[...],
                        dimension_numbers=(((1,), (1,)), ((), ())),
                        preferred_element_type=jnp.float32)

    # Online (streaming) softmax update.
    m_prev = m_sc[...]
    m_new = jnp.maximum(m_prev, jnp.max(s, axis=-1, keepdims=True))
    alpha = jnp.exp(m_prev - m_new)
    p = jnp.exp(s - m_new)
    l_sc[...] = alpha * l_sc[...] + jnp.sum(p, axis=-1, keepdims=True)
    acc_sc[...] = alpha * acc_sc[...] + jnp.dot(
        p.astype(jnp.bfloat16), v_ref[...], preferred_element_type=jnp.float32)
    m_sc[...] = m_new

    @pl.when(kv == pl.num_programs(2) - 1)
    def _finalize():
        o = acc_sc[...] * pl.reciprocal(l_sc[...], approx=True)     # (tq, C) f32
        # Output projection produced directly in channel-major (C, tq) so it can
        # be stored straight into the (N, C, S) output layout (no transpose):
        #   o_cm = Wo @ o^T  via a last-dim/last-dim contraction.
        o_cm = lax.dot_general(wo_ref[...], o.astype(jnp.bfloat16),
                               dimension_numbers=(((1,), (1,)), ((), ())),
                               preferred_element_type=jnp.float32)  # (C, tq)
        out_ref[...] = (o_cm + bo_ref[...]
                        + xres_ref[...].astype(jnp.float32)).astype(out_ref.dtype)


# ---------------------------------------------------------------------------
# Public wrapper.
# ---------------------------------------------------------------------------
@jax.jit
def vae_attention_block(x_nchw, in_proj_w, in_proj_b, out_proj_w, out_proj_b):
    """VAEAttentionBlock.forward.

    Args:
      x_nchw:     (N, C, H, W) activations.
      in_proj_w:  (3C, C)  SelfAttention in_proj weight (PyTorch layout).
      in_proj_b:  (3C,)    SelfAttention in_proj bias.
      out_proj_w: (C, C)   SelfAttention out_proj weight (PyTorch layout).
      out_proj_b: (C,)     SelfAttention out_proj bias.
    Returns:
      (N, C, H, W) tensor, attention(x) + x.
    """
    n, c, h, w = x_nchw.shape
    s = h * w

    # Channel-major (N, C, S) view: a free reshape of NCHW. Used both for the
    # residual read and as the layout of the kernel output (no output-side
    # HBM transpose).
    x_ncs = x_nchw.reshape(n, c, s)
    # Token-major bf16 copy feeding the fused QKV projection (single input-side
    # transpose, at half the bytes since the matmul operands are bf16 anyway).
    x_tok = jnp.transpose(x_ncs, (0, 2, 1)).astype(jnp.bfloat16)

    # Fused QKV projection: y = x @ W^T + b, with the 1/sqrt(C) attention scale
    # folded into the Q columns of both weight and bias.
    scale_vec = jnp.concatenate([
        jnp.full((c,), 1.0 / math.sqrt(c), dtype=jnp.float32),
        jnp.ones((2 * c,), dtype=jnp.float32)])
    w_qkv = (in_proj_w.astype(jnp.float32).T * scale_vec[None, :]).astype(jnp.bfloat16)
    b_qkv = (in_proj_b.astype(jnp.float32) * scale_vec).reshape(1, 3 * c)

    wo = out_proj_w.astype(jnp.bfloat16)              # (C_out, C_in), torch layout
    bo = out_proj_b.astype(jnp.float32).reshape(c, 1)

    ts = _pick_tile(s, 512)   # projection token tile
    tq = _pick_tile(s, 256)   # query tile (lane width of the NCS output store)
    tk = _pick_tile(s, 512)   # key/value tile

    # ---------------- Stage 1: fused QKV projection ----------------
    q, k, v = pl.pallas_call(
        _qkv_proj_kernel,
        out_shape=(jax.ShapeDtypeStruct((n, s, c), jnp.bfloat16),) * 3,
        grid_spec=pltpu.PrefetchScalarGridSpec(
            num_scalar_prefetch=0,
            grid=(n, s // ts),
            in_specs=[
                pl.BlockSpec((None, ts, c), lambda b, i: (b, i, 0)),
                pl.BlockSpec((c, 3 * c), lambda b, i: (0, 0)),
                pl.BlockSpec((1, 3 * c), lambda b, i: (0, 0)),
            ],
            out_specs=(
                pl.BlockSpec((None, ts, c), lambda b, i: (b, i, 0)),
                pl.BlockSpec((None, ts, c), lambda b, i: (b, i, 0)),
                pl.BlockSpec((None, ts, c), lambda b, i: (b, i, 0)),
            ),
        ),
        compiler_params=pltpu.CompilerParams(
            dimension_semantics=("parallel", "parallel"),
            vmem_limit_bytes=64 * 1024 * 1024,
        ),
    )(x_tok, w_qkv, b_qkv)

    # ---------------- Stage 2: flash attention + out proj + residual ---------
    out_ncs = pl.pallas_call(
        _flash_attn_kernel,
        out_shape=jax.ShapeDtypeStruct((n, c, s), x_nchw.dtype),
        grid_spec=pltpu.PrefetchScalarGridSpec(
            num_scalar_prefetch=0,
            grid=(n, s // tq, s // tk),
            in_specs=[
                pl.BlockSpec((None, tq, c), lambda b, qi, ki: (b, qi, 0)),  # q
                pl.BlockSpec((None, tk, c), lambda b, qi, ki: (b, ki, 0)),  # k
                pl.BlockSpec((None, tk, c), lambda b, qi, ki: (b, ki, 0)),  # v
                pl.BlockSpec((c, c), lambda b, qi, ki: (0, 0)),             # Wo
                pl.BlockSpec((c, 1), lambda b, qi, ki: (0, 0)),             # bo
                pl.BlockSpec((None, c, tq), lambda b, qi, ki: (b, 0, qi)),  # residual
            ],
            out_specs=pl.BlockSpec((None, c, tq), lambda b, qi, ki: (b, 0, qi)),
            scratch_shapes=[
                pltpu.VMEM((tq, 1), jnp.float32),   # running max
                pltpu.VMEM((tq, 1), jnp.float32),   # running denominator
                pltpu.VMEM((tq, c), jnp.float32),   # output accumulator
            ],
        ),
        compiler_params=pltpu.CompilerParams(
            dimension_semantics=("parallel", "parallel", "arbitrary"),
            vmem_limit_bytes=64 * 1024 * 1024,
        ),
    )(q, k, v, wo, bo, x_ncs)

    return out_ncs.reshape(n, c, h, w)


# ---------------------------------------------------------------------------
# Plain-JAX f32 reference mirroring the PyTorch forward.
# ---------------------------------------------------------------------------
def _reference(x_nchw, in_proj_w, in_proj_b, out_proj_w, out_proj_b):
    n, c, h, w = x_nchw.shape
    x = jnp.transpose(x_nchw.reshape(n, c, h * w), (0, 2, 1))   # (N, S, C)
    qkv = x @ in_proj_w.T + in_proj_b
    q, k, v = jnp.split(qkv, 3, axis=-1)
    p = jax.nn.softmax((q @ jnp.swapaxes(k, -1, -2)) / math.sqrt(c), axis=-1)
    o = (p @ v) @ out_proj_w.T + out_proj_b
    o = o + x
    return jnp.transpose(o, (0, 2, 1)).reshape(n, c, h, w)


if __name__ == "__main__":
    # Small shapes consistent with the module: batch=2, channels=32, spatial 8x8.
    N, C, H, W = 2, 32, 8, 8

    key = jax.random.PRNGKey(0)
    kx, kw_in, kb_in, kw_out, kb_out = jax.random.split(key, 5)

    x = jax.random.normal(kx, (N, C, H, W), dtype=jnp.float32)

    # SelfAttention(1, C) parameters in PyTorch state_dict layout.
    in_proj_w = jax.random.normal(kw_in, (3 * C, C), jnp.float32) / math.sqrt(C)
    in_proj_b = jax.random.normal(kb_in, (3 * C,), jnp.float32) * 0.02
    out_proj_w = jax.random.normal(kw_out, (C, C), jnp.float32) / math.sqrt(C)
    out_proj_b = jax.random.normal(kb_out, (C,), jnp.float32) * 0.02

    # GroupNorm(16, C) params exist in the module's __init__ but are never used
    # in forward(); intentionally not applied (faithful to the reference code).

    out = jax.block_until_ready(
        vae_attention_block(x, in_proj_w, in_proj_b, out_proj_w, out_proj_b))
    ref = _reference(x, in_proj_w, in_proj_b, out_proj_w, out_proj_b)

    assert out.shape == (N, C, H, W)
    # bf16 MXU operands (f32 accumulation) => loosened tolerance vs f32 reference.
    err = float(jnp.max(jnp.abs(out - ref)))
    assert jnp.allclose(out, ref, rtol=5e-2, atol=5e-2), f"mismatch, max abs err {err:.3e}"
    print("KERNEL_OK")
</pallas_src>

<mosaic_0001>
module attributes {stable_mosaic.version = 11 : i64} {
  func.func @_qkv_proj_kernel(%arg0: i32, %arg1: i32, %arg2: memref<1x64x32xbf16, #tpu.memory_space<vmem>>, %arg3: memref<32x96xbf16, #tpu.memory_space<vmem>>, %arg4: memref<1x96xf32, #tpu.memory_space<vmem>>, %arg5: memref<1x64x32xbf16, #tpu.memory_space<vmem>>, %arg6: memref<1x64x32xbf16, #tpu.memory_space<vmem>>, %arg7: memref<1x64x32xbf16, #tpu.memory_space<vmem>>) attributes {dimension_semantics = [#tpu.dimension_semantics<parallel>, #tpu.dimension_semantics<parallel>], iteration_bounds = array<i64: 2, 1>, scalar_prefetch = 0 : i64, scratch_operands = 0 : i64, tpu.core_type = #tpu.core_type<tc>, window_params = [{transform_indices = @transform_0, window_bounds = array<i64: 1, 64, 32>}, {pipeline_mode = #tpu.pipeline_mode<synchronous>, transform_indices = @transform_1, window_bounds = array<i64: 32, 96>}, {pipeline_mode = #tpu.pipeline_mode<synchronous>, transform_indices = @transform_2, window_bounds = array<i64: 1, 96>}, {transform_indices = @transform_3, window_bounds = array<i64: 1, 64, 32>}, {transform_indices = @transform_4, window_bounds = array<i64: 1, 64, 32>}, {transform_indices = @transform_5, window_bounds = array<i64: 1, 64, 32>}]} {
    %c0 = arith.constant 0 : index
    %c0_0 = arith.constant 0 : index
    %c0_1 = arith.constant 0 : index
    %0 = vector.load %arg2[%c0, %c0_0, %c0_1] : memref<1x64x32xbf16, #tpu.memory_space<vmem>>, vector<1x64x32xbf16>
    %1 = vector.shape_cast %0 : vector<1x64x32xbf16> to vector<64x32xbf16>
    %c0_2 = arith.constant 0 : index
    %c0_3 = arith.constant 0 : index
    %2 = vector.load %arg3[%c0_2, %c0_3] : memref<32x96xbf16, #tpu.memory_space<vmem>>, vector<32x96xbf16>
    %cst = arith.constant dense<0.000000e+00> : vector<64x96xf32>
    %3 = tpu.matmul %1, %2, %cst {dimension_numbers = #tpu.dot_dimension_numbers<[1], [0], [0], [1], [0, 0, 1, 1], [], []>} : vector<64x32xbf16>, vector<32x96xbf16>, vector<64x96xf32> -> vector<64x96xf32>
    %c0_4 = arith.constant 0 : index
    %c0_5 = arith.constant 0 : index
    %4 = vector.load %arg4[%c0_4, %c0_5] : memref<1x96xf32, #tpu.memory_space<vmem>>, vector<1x96xf32>
    %5 = vector.broadcast %4 : vector<1x96xf32> to vector<64x96xf32>
    %6 = arith.addf %3, %5 : vector<64x96xf32>
    %7 = vector.extract_strided_slice %6 {offsets = [0, 0], sizes = [64, 32], strides = [1, 1]} : vector<64x96xf32> to vector<64x32xf32>
    %8 = arith.truncf %7 : vector<64x32xf32> to vector<64x32xbf16>
    %c0_6 = arith.constant 0 : index
    %c0_7 = arith.constant 0 : index
    %c0_8 = arith.constant 0 : index
    %9 = vector.load %arg5[%c0_6, %c0_7, %c0_8] : memref<1x64x32xbf16, #tpu.memory_space<vmem>>, vector<1x64x32xbf16>
    %10 = vector.shape_cast %9 : vector<1x64x32xbf16> to vector<64x32xbf16>
    %11 = vector.shape_cast %8 : vector<64x32xbf16> to vector<1x64x32xbf16>
    tpu.vector_store %arg5[%c0_6, %c0_7, %c0_8], %11 {strides = array<i32>} : memref<1x64x32xbf16, #tpu.memory_space<vmem>>, vector<1x64x32xbf16>,
    %12 = vector.extract_strided_slice %6 {offsets = [0, 32], sizes = [64, 32], strides = [1, 1]} : vector<64x96xf32> to vector<64x32xf32>
    %13 = arith.truncf %12 : vector<64x32xf32> to vector<64x32xbf16>
    %c0_9 = arith.constant 0 : index
    %c0_10 = arith.constant 0 : index
    %c0_11 = arith.constant 0 : index
    %14 = vector.load %arg6[%c0_9, %c0_10, %c0_11] : memref<1x64x32xbf16, #tpu.memory_space<vmem>>, vector<1x64x32xbf16>
    %15 = vector.shape_cast %14 : vector<1x64x32xbf16> to vector<64x32xbf16>
    %16 = vector.shape_cast %13 : vector<64x32xbf16> to vector<1x64x32xbf16>
    tpu.vector_store %arg6[%c0_9, %c0_10, %c0_11], %16 {strides = array<i32>} : memref<1x64x32xbf16, #tpu.memory_space<vmem>>, vector<1x64x32xbf16>,
    %17 = vector.extract_strided_slice %6 {offsets = [0, 64], sizes = [64, 32], strides = [1, 1]} : vector<64x96xf32> to vector<64x32xf32>
    %18 = arith.truncf %17 : vector<64x32xf32> to vector<64x32xbf16>
    %c0_12 = arith.constant 0 : index
    %c0_13 = arith.constant 0 : index
    %c0_14 = arith.constant 0 : index
    %19 = vector.load %arg7[%c0_12, %c0_13, %c0_14] : memref<1x64x32xbf16, #tpu.memory_space<vmem>>, vector<1x64x32xbf16>
    %20 = vector.shape_cast %19 : vector<1x64x32xbf16> to vector<64x32xbf16>
    %21 = vector.shape_cast %18 : vector<64x32xbf16> to vector<1x64x32xbf16>
    tpu.vector_store %arg7[%c0_12, %c0_13, %c0_14], %21 {strides = array<i32>} : memref<1x64x32xbf16, #tpu.memory_space<vmem>>, vector<1x64x32xbf16>,
    return
  }
  func.func @transform_0(%arg0: i32, %arg1: i32) -> (i32, i32, i32) {
    %c0_i32 = arith.constant 0 : i32
    %c0_i32_0 = arith.constant 0 : i32
    return %arg0, %arg1, %c0_i32 : i32, i32, i32
  }
  func.func @transform_1(%arg0: i32, %arg1: i32) -> (i32, i32) {
    %c0_i32 = arith.constant 0 : i32
    %c0_i32_0 = arith.constant 0 : i32
    %c0_i32_1 = arith.constant 0 : i32
    return %c0_i32, %c0_i32_0 : i32, i32
  }
  func.func @transform_2(%arg0: i32, %arg1: i32) -> (i32, i32) {
    %c0_i32 = arith.constant 0 : i32
    %c0_i32_0 = arith.constant 0 : i32
    %c0_i32_1 = arith.constant 0 : i32
    return %c0_i32, %c0_i32_0 : i32, i32
  }
  func.func @transform_3(%arg0: i32, %arg1: i32) -> (i32, i32, i32) {
    %c0_i32 = arith.constant 0 : i32
    %c0_i32_0 = arith.constant 0 : i32
    return %arg0, %arg1, %c0_i32 : i32, i32, i32
  }
  func.func @transform_4(%arg0: i32, %arg1: i32) -> (i32, i32, i32) {
    %c0_i32 = arith.constant 0 : i32
    %c0_i32_0 = arith.constant 0 : i32
    return %arg0, %arg1, %c0_i32 : i32, i32, i32
  }
  func.func @transform_5(%arg0: i32, %arg1: i32) -> (i32, i32, i32) {
    %c0_i32 = arith.constant 0 : i32
    %c0_i32_0 = arith.constant 0 : i32
    return %arg0, %arg1, %c0_i32 : i32, i32, i32
  }
}

module attributes {stable_mosaic.version = 11 : i64} {
  func.func @_flash_attn_kernel(%arg0: i32, %arg1: i32, %arg2: i32, %arg3: memref<1x64x32xbf16, #tpu.memory_space<vmem>>, %arg4: memref<1x64x32xbf16, #tpu.memory_space<vmem>>, %arg5: memref<1x64x32xbf16, #tpu.memory_space<vmem>>, %arg6: memref<32x32xbf16, #tpu.memory_space<vmem>>, %arg7: memref<32x1xf32, #tpu.memory_space<vmem>>, %arg8: memref<1x32x64xf32, #tpu.memory_space<vmem>>, %arg9: memref<1x32x64xf32, #tpu.memory_space<vmem>>, %arg10: memref<64x1xf32, #tpu.memory_space<vmem>>, %arg11: memref<64x1xf32, #tpu.memory_space<vmem>>, %arg12: memref<64x32xf32, #tpu.memory_space<vmem>>) attributes {dimension_semantics = [#tpu.dimension_semantics<parallel>, #tpu.dimension_semantics<parallel>, #tpu.dimension_semantics<arbitrary>], iteration_bounds = array<i64: 2, 1, 1>, scalar_prefetch = 0 : i64, scratch_operands = 3 : i64, tpu.core_type = #tpu.core_type<tc>, window_params = [{transform_indices = @transform_0, window_bounds = array<i64: 1, 64, 32>}, {transform_indices = @transform_1, window_bounds = array<i64: 1, 64, 32>}, {transform_indices = @transform_2, window_bounds = array<i64: 1, 64, 32>}, {pipeline_mode = #tpu.pipeline_mode<synchronous>, transform_indices = @transform_3, window_bounds = array<i64: 32, 32>}, {pipeline_mode = #tpu.pipeline_mode<synchronous>, transform_indices = @transform_4, window_bounds = array<i64: 32, 1>}, {transform_indices = @transform_5, window_bounds = array<i64: 1, 32, 64>}, {transform_indices = @transform_6, window_bounds = array<i64: 1, 32, 64>}]} {
    %c0_i32 = arith.constant 0 : i32
    %0 = arith.cmpi eq, %arg2, %c0_i32 : i32
    %1 = arith.extui %0 : i1 to i32
    %c0_i32_0 = arith.constant 0 : i32
    %2 = arith.cmpi ne, %1, %c0_i32_0 : i32
    scf.if %2 {
      %cst_26 = arith.constant 0xFF800000 : f32
      %36 = vector.broadcast %cst_26 : f32 to vector<64x1xf32>
      %c0_27 = arith.constant 0 : index
      %c0_28 = arith.constant 0 : index
      %37 = vector.load %arg10[%c0_27, %c0_28] : memref<64x1xf32, #tpu.memory_space<vmem>>, vector<64x1xf32>
      tpu.vector_store %arg10[%c0_27, %c0_28], %36 {strides = array<i32>} : memref<64x1xf32, #tpu.memory_space<vmem>>, vector<64x1xf32>,
      %cst_29 = arith.constant 0.000000e+00 : f32
      %38 = vector.broadcast %cst_29 : f32 to vector<64x1xf32>
      %c0_30 = arith.constant 0 : index
      %c0_31 = arith.constant 0 : index
      %39 = vector.load %arg11[%c0_30, %c0_31] : memref<64x1xf32, #tpu.memory_space<vmem>>, vector<64x1xf32>
      tpu.vector_store %arg11[%c0_30, %c0_31], %38 {strides = array<i32>} : memref<64x1xf32, #tpu.memory_space<vmem>>, vector<64x1xf32>,
      %cst_32 = arith.constant 0.000000e+00 : f32
      %40 = vector.broadcast %cst_32 : f32 to vector<64x32xf32>
      %c0_33 = arith.constant 0 : index
      %c0_34 = arith.constant 0 : index
      %41 = vector.load %arg12[%c0_33, %c0_34] : memref<64x32xf32, #tpu.memory_space<vmem>>, vector<64x32xf32>
      tpu.vector_store %arg12[%c0_33, %c0_34], %40 {strides = array<i32>} : memref<64x32xf32, #tpu.memory_space<vmem>>, vector<64x32xf32>,
    } else {
    }
    %c0 = arith.constant 0 : index
    %c0_1 = arith.constant 0 : index
    %c0_2 = arith.constant 0 : index
    %3 = vector.load %arg3[%c0, %c0_1, %c0_2] : memref<1x64x32xbf16, #tpu.memory_space<vmem>>, vector<1x64x32xbf16>
    %4 = vector.shape_cast %3 : vector<1x64x32xbf16> to vector<64x32xbf16>
    %c0_3 = arith.constant 0 : index
    %c0_4 = arith.constant 0 : index
    %c0_5 = arith.constant 0 : index
    %5 = vector.load %arg4[%c0_3, %c0_4, %c0_5] : memref<1x64x32xbf16, #tpu.memory_space<vmem>>, vector<1x64x32xbf16>
    %6 = vector.shape_cast %5 : vector<1x64x32xbf16> to vector<64x32xbf16>
    %cst = arith.constant dense<0.000000e+00> : vector<64x64xf32>
    %7 = tpu.matmul %4, %6, %cst {dimension_numbers = #tpu.dot_dimension_numbers<[1], [1], [0], [0], [0, 0, 1, 0], [], []>} : vector<64x32xbf16>, vector<64x32xbf16>, vector<64x64xf32> -> vector<64x64xf32>
    %c0_6 = arith.constant 0 : index
    %c0_7 = arith.constant 0 : index
    %8 = vector.load %arg10[%c0_6, %c0_7] : memref<64x1xf32, #tpu.memory_space<vmem>>, vector<64x1xf32>
    %cst_8 = arith.constant dense<0xFF800000> : vector<64xf32>
    %9 = vector.multi_reduction <maximumf>, %7, %cst_8 [1] : vector<64x64xf32> to vector<64xf32>
    %10 = vector.shape_cast %9 : vector<64xf32> to vector<64x1xf32>
    %11 = arith.maximumf %8, %10 : vector<64x1xf32>
    %12 = arith.subf %8, %11 : vector<64x1xf32>
    %13 = math.exp %12 : vector<64x1xf32>
    %14 = vector.broadcast %11 : vector<64x1xf32> to vector<64x64xf32>
    %15 = arith.subf %7, %14 : vector<64x64xf32>
    %16 = math.exp %15 : vector<64x64xf32>
    %c0_9 = arith.constant 0 : index
    %c0_10 = arith.constant 0 : index
    %17 = vector.load %arg11[%c0_9, %c0_10] : memref<64x1xf32, #tpu.memory_space<vmem>>, vector<64x1xf32>
    %18 = arith.mulf %13, %17 : vector<64x1xf32>
    %cst_11 = arith.constant dense<0.000000e+00> : vector<64xf32>
    %19 = vector.multi_reduction <add>, %16, %cst_11 [1] : vector<64x64xf32> to vector<64xf32>
    %20 = vector.shape_cast %19 : vector<64xf32> to vector<64x1xf32>
    %21 = arith.addf %18, %20 : vector<64x1xf32>
    %c0_12 = arith.constant 0 : index
    %c0_13 = arith.constant 0 : index
    %22 = vector.load %arg11[%c0_12, %c0_13] : memref<64x1xf32, #tpu.memory_space<vmem>>, vector<64x1xf32>
    tpu.vector_store %arg11[%c0_12, %c0_13], %21 {strides = array<i32>} : memref<64x1xf32, #tpu.memory_space<vmem>>, vector<64x1xf32>,
    %c0_14 = arith.constant 0 : index
    %c0_15 = arith.constant 0 : index
    %23 = vector.load %arg12[%c0_14, %c0_15] : memref<64x32xf32, #tpu.memory_space<vmem>>, vector<64x32xf32>
    %24 = vector.broadcast %13 : vector<64x1xf32> to vector<64x32xf32>
    %25 = arith.mulf %24, %23 : vector<64x32xf32>
    %26 = arith.truncf %16 : vector<64x64xf32> to vector<64x64xbf16>
    %c0_16 = arith.constant 0 : index
    %c0_17 = arith.constant 0 : index
    %c0_18 = arith.constant 0 : index
    %27 = vector.load %arg5[%c0_16, %c0_17, %c0_18] : memref<1x64x32xbf16, #tpu.memory_space<vmem>>, vector<1x64x32xbf16>
    %28 = vector.shape_cast %27 : vector<1x64x32xbf16> to vector<64x32xbf16>
    %cst_19 = arith.constant dense<0.000000e+00> : vector<64x32xf32>
    %29 = tpu.matmul %26, %28, %cst_19 {dimension_numbers = #tpu.dot_dimension_numbers<[1], [0], [0], [1], [0, 0, 1, 1], [], []>} : vector<64x64xbf16>, vector<64x32xbf16>, vector<64x32xf32> -> vector<64x32xf32>
    %30 = arith.addf %25, %29 : vector<64x32xf32>
    %c0_20 = arith.constant 0 : index
    %c0_21 = arith.constant 0 : index
    %31 = vector.load %arg12[%c0_20, %c0_21] : memref<64x32xf32, #tpu.memory_space<vmem>>, vector<64x32xf32>
    tpu.vector_store %arg12[%c0_20, %c0_21], %30 {strides = array<i32>} : memref<64x32xf32, #tpu.memory_space<vmem>>, vector<64x32xf32>,
    %c0_22 = arith.constant 0 : index
    %c0_23 = arith.constant 0 : index
    %32 = vector.load %arg10[%c0_22, %c0_23] : memref<64x1xf32, #tpu.memory_space<vmem>>, vector<64x1xf32>
    tpu.vector_store %arg10[%c0_22, %c0_23], %11 {strides = array<i32>} : memref<64x1xf32, #tpu.memory_space<vmem>>, vector<64x1xf32>,
    %c0_i32_24 = arith.constant 0 : i32
    %33 = arith.cmpi eq, %arg2, %c0_i32_24 : i32
    %34 = arith.extui %33 : i1 to i32
    %c0_i32_25 = arith.constant 0 : i32
    %35 = arith.cmpi ne, %34, %c0_i32_25 : i32
    scf.if %35 {
      %c0_26 = arith.constant 0 : index
      %c0_27 = arith.constant 0 : index
      %36 = vector.load %arg12[%c0_26, %c0_27] : memref<64x32xf32, #tpu.memory_space<vmem>>, vector<64x32xf32>
      %c0_28 = arith.constant 0 : index
      %c0_29 = arith.constant 0 : index
      %37 = vector.load %arg11[%c0_28, %c0_29] : memref<64x1xf32, #tpu.memory_space<vmem>>, vector<64x1xf32>
      %38 = tpu.reciprocal %37 {approx = true} : vector<64x1xf32> -> vector<64x1xf32>
      %39 = vector.broadcast %38 : vector<64x1xf32> to vector<64x32xf32>
      %40 = arith.mulf %36, %39 : vector<64x32xf32>
      %c0_30 = arith.constant 0 : index
      %c0_31 = arith.constant 0 : index
      %41 = vector.load %arg6[%c0_30, %c0_31] : memref<32x32xbf16, #tpu.memory_space<vmem>>, vector<32x32xbf16>
      %42 = arith.truncf %40 : vector<64x32xf32> to vector<64x32xbf16>
      %cst_32 = arith.constant dense<0.000000e+00> : vector<32x64xf32>
      %43 = tpu.matmul %41, %42, %cst_32 {dimension_numbers = #tpu.dot_dimension_numbers<[1], [1], [0], [0], [0, 0, 1, 0], [], []>} : vector<32x32xbf16>, vector<64x32xbf16>, vector<32x64xf32> -> vector<32x64xf32>
      %c0_33 = arith.constant 0 : index
      %c0_34 = arith.constant 0 : index
      %44 = vector.load %arg7[%c0_33, %c0_34] : memref<32x1xf32, #tpu.memory_space<vmem>>, vector<32x1xf32>
      %45 = vector.broadcast %44 : vector<32x1xf32> to vector<32x64xf32>
      %46 = arith.addf %43, %45 : vector<32x64xf32>
      %c0_35 = arith.constant 0 : index
      %c0_36 = arith.constant 0 : index
      %c0_37 = arith.constant 0 : index
      %47 = vector.load %arg8[%c0_35, %c0_36, %c0_37] : memref<1x32x64xf32, #tpu.memory_space<vmem>>, vector<1x32x64xf32>
      %48 = vector.shape_cast %47 : vector<1x32x64xf32> to vector<32x64xf32>
      %49 = arith.addf %46, %48 : vector<32x64xf32>
      %c0_38 = arith.constant 0 : index
      %c0_39 = arith.constant 0 : index
      %c0_40 = arith.constant 0 : index
      %50 = vector.load %arg9[%c0_38, %c0_39, %c0_40] : memref<1x32x64xf32, #tpu.memory_space<vmem>>, vector<1x32x64xf32>
      %51 = vector.shape_cast %50 : vector<1x32x64xf32> to vector<32x64xf32>
      %52 = vector.shape_cast %49 : vector<32x64xf32> to vector<1x32x64xf32>
      tpu.vector_store %arg9[%c0_38, %c0_39, %c0_40], %52 {strides = array<i32>} : memref<1x32x64xf32, #tpu.memory_space<vmem>>, vector<1x32x64xf32>,
    } else {
    }
    return
  }
  func.func @transform_0(%arg0: i32, %arg1: i32, %arg2: i32) -> (i32, i32, i32) {
    %c0_i32 = arith.constant 0 : i32
    %c0_i32_0 = arith.constant 0 : i32
    return %arg0, %arg1, %c0_i32 : i32, i32, i32
  }
  func.func @transform_1(%arg0: i32, %arg1: i32, %arg2: i32) -> (i32, i32, i32) {
    %c0_i32 = arith.constant 0 : i32
    %c0_i32_0 = arith.constant 0 : i32
    return %arg0, %arg2, %c0_i32 : i32, i32, i32
  }
  func.func @transform_2(%arg0: i32, %arg1: i32, %arg2: i32) -> (i32, i32, i32) {
    %c0_i32 = arith.constant 0 : i32
    %c0_i32_0 = arith.constant 0 : i32
    return %arg0, %arg2, %c0_i32 : i32, i32, i32
  }
  func.func @transform_3(%arg0: i32, %arg1: i32, %arg2: i32) -> (i32, i32) {
    %c0_i32 = arith.constant 0 : i32
    %c0_i32_0 = arith.constant 0 : i32
    %c0_i32_1 = arith.constant 0 : i32
    return %c0_i32, %c0_i32_0 : i32, i32
  }
  func.func @transform_4(%arg0: i32, %arg1: i32, %arg2: i32) -> (i32, i32) {
    %c0_i32 = arith.constant 0 : i32
    %c0_i32_0 = arith.constant 0 : i32
    %c0_i32_1 = arith.constant 0 : i32
    return %c0_i32, %c0_i32_0 : i32, i32
  }
  func.func @transform_5(%arg0: i32, %arg1: i32, %arg2: i32) -> (i32, i32, i32) {
    %c0_i32 = arith.constant 0 : i32
    %c0_i32_0 = arith.constant 0 : i32
    return %arg0, %c0_i32, %arg1 : i32, i32, i32
  }
  func.func @transform_6(%arg0: i32, %arg1: i32, %arg2: i32) -> (i32, i32, i32) {
    %c0_i32 = arith.constant 0 : i32
    %c0_i32_0 = arith.constant 0 : i32
    return %arg0, %c0_i32, %arg1 : i32, i32, i32
  }
}

</mosaic_0001>

<bundles_post_ra>
// kernel: vae_attention_block.2
= control target key start
LH: loop header
LB: loop body
LE: loop exit
PB: predicated region body
PF: predicated region fallthrough
CT: control target
= control target key end

     0   :  { %s889_s18 = smov 0   ;;  %s891_s19 = smov 0   ;;  %s985_s0 = inlined_call_operand.vmem [shape: bf16[2,64,32], index: 0, kind: input, shape index: {}]   ;;  %s986_s1 = inlined_call_operand.vmem [shape: bf16[32,96], index: 1, kind: input, shape index: {}]   ;;  %s987_s2 = inlined_call_operand.vmem [shape: f32[1,96], index: 2, kind: input, shape index: {}]   ;;  %s988_s3 = inlined_call_operand.vmem [shape: bf16[2,64,32], index: 3, kind: output, shape index: {0}]   ;;  %s989_s4 = inlined_call_operand.vmem [shape: bf16[2,64,32], index: 4, kind: output, shape index: {1}]   ;;  %s990_s5 = inlined_call_operand.vmem [shape: bf16[2,64,32], index: 5, kind: output, shape index: {2}]  }
   0x1   :  { %s893_s20 = smov 0  }
   0x2 LB: > { %s28_s21 = sadd.s32 1, %s851_s19  ;;  %p737_p0 = scmp.ge.s32.totalorder %s855_s20, 1  ;;  %s855_s20 = sphi %s893_s20, %s16_s20   ;;  %s851_s19 = sphi %s891_s19, %s992_s19   ;;  %s847_s18 = sphi %s889_s18, %s991_s18  }
   0x3   : > { %p30_p1 = scmp.ge.s32.totalorder %s28_s21, 2  ;;  %p217_p2 = scmp.lt.s32.totalorder %s855_s20, 3 }
   0x5   : > { %s994_s21 = smov (%p30_p1, %s28_s21), 0  ;;  %p218_p3 = pnand %p737_p0, %p217_p2 }
   0x6   : > { %p272_p4 = scmp.lt.s32.totalorder (!%p218_p3), %s847_s18, 1  ;;  %s857_s10 = smov (!%p218_p3), 96  }
   0x7   : > { %221 = sbr.rel (%p218_p3) target bundleno = 363 (0x16b), region = 32  ;;  %s858_s11 = smov (!%p218_p3), 64  }
   0xc   : > { %v827_v0 = vld [vmem:[%s986_s1 + $0x8] sm:$0xff]   ;;  %v828_v1 = vld [vmem:[%s986_s1] sm:$0xff]   ;;  %s996_s18 = smov (!%p272_p4, %s847_s18), 1  ;;  %vm363_vm0 = vcmask 261120   ;;  %vm473_vm1 = vcmask 257024  }
   0xd   : > { %785 = vmatprep.subr.bf16.mxu0 %v827_v0  ;;  %797 = vmatprep.subr.bf16.mxu1 %v827_v0  ;;  %s913_s26 = sshll.u32 %s996_s18, 5  ;;  %v746_v6 = vld [vmem:[%s987_s2] ss:$0 sm:$0xff] }
   0xe   : > { %786 = vmatpush3.bf16.msra.mxu0 %v827_v0  ;;  %799 = vmatpush3.bf16.msra.mxu1 %v827_v0  ;;  %s279_s29 = scalar_lea.vmem %s985_s0, %s913_s26  ;;  %s926_s9 = scalar_lea.vmem %s988_s3, %s913_s26 }
   0xf   : > { %787 = vmatprep.subr.bf16.mxu0 %v828_v1  ;;  %798 = vmatprep.subr.bf16.mxu1 %v828_v1  ;;  %v829_v2 = vld [vmem:[%s279_s29] sm:$0xff]   ;;  %v830_v3 = vld [vmem:[%s279_s29 + $0x10] sm:$0xff]   ;;  %v831_v4 = vld [vmem:[%s279_s29 + $0x8] sm:$0xff]   ;;  %s299_s14 = scalar_lea.vmem %s989_s4, %s913_s26  ;;  %s309_s17 = scalar_lea.vmem %s990_s5, %s913_s26 }
  0x10   : > { %789 = vmatprep.mubr.msk.bf16.mxu0 %vm363_vm0, %v829_v2  ;;  %793 = vmatprep.mubr.msk.bf16.mxu1 %vm363_vm0, %v830_v3  ;;  %v832_v5 = vld [vmem:[%s279_s29 + $0x18] sm:$0xff]  }
  0x12   : > { %788 = vmatpush3.bf16.msra.mxu0 %v828_v1  ;;  %800 = vmatpush3.bf16.msra.mxu1 %v828_v1 }
  0x15   : > { %790 = vmatmul.mubr.msk.bf16.vlgmr.msra.gmra.mxu0 %vm363_vm0, %v831_v4  ;;  %794 = vmatmul.mubr.msk.bf16.vlgmr.msra.gmra.mxu1 %vm363_vm0, %v832_v5 }
  0xd5   : > { %v791_v7 = vpop.f32.mrf.mxu0  ;;  %v795_v9 = vpop.f32.mrf.mxu1 }
  0xd6   : > { %v419_v8 = vadd.f32 %v791_v7, %v746_v6  ;;  %v435_v10 = vadd.f32 %v795_v9, %v746_v6 }
  0xd7   : > { %v410_v11 = vpop.f32.mrf.mxu0  ;;  %v426_v14 = vpop.f32.mrf.mxu1 }
  0xd8   : > { %v773_v12 = vpack.c.bf16 %v419_v8, %v419_v8  ;;  %v411_v13 = vadd.f32 %v746_v6, %v410_v11  ;;  %v777_v15 = vpack.c.bf16 %v435_v10, %v435_v10  ;;  %v427_v16 = vadd.f32 %v746_v6, %v426_v14 }
  0xd9   : > { %v792_v17 = vpop.f32.mrf.mxu0  ;;  %v796_v20 = vpop.f32.mrf.mxu1 }
  0xda   : > { %476 = vst.msk [vmem:[%s926_s9 + $0x8] sm:$0xf] %vm473_vm1, %v773_v12  ;;  %v771_v18 = vpack.c.bf16 %v411_v13, %v411_v13  ;;  %v422_v19 = vadd.f32 %v792_v17, %v746_v6  ;;  %486 = vrot.lane.b32.xlu1 %v773_v12, %s857_s10  ;;  %480 = vst.msk [vmem:[%s926_s9 + $0x18] sm:$0xf] %vm473_vm1, %v777_v15  ;;  %v775_v21 = vpack.c.bf16 %v427_v16, %v427_v16 }
  0xdb   : > { %v438_v22 = vadd.f32 %v796_v20, %v746_v6  ;;  %494 = vrot.lane.b32.xlu0 %v777_v15, %s857_s10  ;;  %v413_v23 = vpop.f32.mrf.mxu0  ;;  %v429_v26 = vpop.f32.mrf.mxu1 }
  0xdc   : > { %474 = vst.msk [vmem:[%s926_s9] sm:$0xf] %vm473_vm1, %v771_v18  ;;  %v774_v24 = vpack.c.bf16 %v422_v19, %v422_v19  ;;  %v414_v25 = vadd.f32 %v746_v6, %v413_v23  ;;  %478 = vst.msk [vmem:[%s926_s9 + $0x10] sm:$0xf] %vm473_vm1, %v775_v21  ;;  %v430_v28 = vadd.f32 %v746_v6, %v429_v26 }
  0xdd   : > { %v778_v27 = vpack.c.bf16 %v438_v22, %v438_v22 }
  0xde   : > { %477 = vst.msk [vmem:[%s926_s9 + $0xc] sm:$0xf] %vm473_vm1, %v774_v24  ;;  %v772_v29 = vpack.c.bf16 %v414_v25, %v414_v25  ;;  %488 = vrot.lane.b32.xlu1 %v774_v24, %s857_s10  ;;  %v776_v30 = vpack.c.bf16 %v430_v28, %v430_v28 }
  0xdf   : > { %481 = vst.msk [vmem:[%s926_s9 + $0x1c] sm:$0xf] %vm473_vm1, %v778_v27  ;;  %518 = vrot.lane.b32.xlu0 %v773_v12, %s858_s11 }
  0xe0   : > { %475 = vst.msk [vmem:[%s926_s9 + $0x4] sm:$0xf] %vm473_vm1, %v772_v29  ;;  %479 = vst.msk [vmem:[%s926_s9 + $0x14] sm:$0xf] %vm473_vm1, %v776_v30 }
  0xe2   : > { %496 = vrot.lane.b32.xlu1 %v778_v27, %s857_s10 }
  0xe3   : > { %482 = vrot.lane.b32.xlu0 %v771_v18, %s857_s10 }
  0xe6   : > { %520 = vrot.lane.b32.xlu1 %v774_v24, %s858_s11 }
  0xe7   : > { %490 = vrot.lane.b32.xlu0 %v775_v21, %s857_s10 }
  0xea   : > { %492 = vrot.lane.b32.xlu1 %v776_v30, %s857_s10 }
  0xeb   : > { %514 = vrot.lane.b32.xlu0 %v771_v18, %s858_s11 }
  0xee   : > { %516 = vrot.lane.b32.xlu1 %v772_v29, %s858_s11 }
  0xef   : > { %522 = vrot.lane.b32.xlu0 %v775_v21, %s858_s11 }
  0xf2   : > { %524 = vrot.lane.b32.xlu1 %v776_v30, %s858_s11 }
  0xf3   : > { %484 = vrot.lane.b32.xlu0 %v772_v29, %s857_s10 }
  0xf6   : > { %528 = vrot.lane.b32.xlu1 %v778_v27, %s858_s11 }
  0xf7   : > { %526 = vrot.lane.b32.xlu0 %v777_v15, %s858_s11 }
 0x14c   : > { %v487_v31 = vpop.permute.xlu1 %486 }
 0x14d   : > { %v495_v32 = vpop.permute.xlu0 %494  ;;  %508 = vst.msk [vmem:[%s299_s14 + $0x8] sm:$0xf] %vm473_vm1, %v487_v31 }
 0x14e   : > { %512 = vst.msk [vmem:[%s299_s14 + $0x18] sm:$0xf] %vm473_vm1, %v495_v32 }
 0x150   : > { %v489_v33 = vpop.permute.xlu1 %488 }
 0x151   : > { %v519_v34 = vpop.permute.xlu0 %518  ;;  %509 = vst.msk [vmem:[%s299_s14 + $0xc] sm:$0xf] %vm473_vm1, %v489_v33 }
 0x152   : > { %540 = vst.msk [vmem:[%s309_s17 + $0x8] sm:$0xf] %vm473_vm1, %v519_v34 }
 0x154   : > { %v497_v35 = vpop.permute.xlu1 %496 }
 0x155   : > { %513 = vst.msk [vmem:[%s299_s14 + $0x1c] sm:$0xf] %vm473_vm1, %v497_v35  ;;  %v483_v36 = vpop.permute.xlu0 %482 }
 0x156   : > { %506 = vst.msk [vmem:[%s299_s14] sm:$0xf] %vm473_vm1, %v483_v36 }
 0x158   : > { %v521_v37 = vpop.permute.xlu1 %520 }
 0x159   : > { %541 = vst.msk [vmem:[%s309_s17 + $0xc] sm:$0xf] %vm473_vm1, %v521_v37  ;;  %v491_v38 = vpop.permute.xlu0 %490 }
 0x15a   : > { %510 = vst.msk [vmem:[%s299_s14 + $0x10] sm:$0xf] %vm473_vm1, %v491_v38 }
 0x15c   : > { %v493_v39 = vpop.permute.xlu1 %492 }
 0x15d   : > { %511 = vst.msk [vmem:[%s299_s14 + $0x14] sm:$0xf] %vm473_vm1, %v493_v39  ;;  %v515_v40 = vpop.permute.xlu0 %514 }
 0x15e   : > { %538 = vst.msk [vmem:[%s309_s17] sm:$0xf] %vm473_vm1, %v515_v40 }
 0x160   : > { %v517_v41 = vpop.permute.xlu1 %516 }
 0x161   : > { %539 = vst.msk [vmem:[%s309_s17 + $0x4] sm:$0xf] %vm473_vm1, %v517_v41  ;;  %v523_v42 = vpop.permute.xlu0 %522 }
 0x162   : > { %542 = vst.msk [vmem:[%s309_s17 + $0x10] sm:$0xf] %vm473_vm1, %v523_v42 }
 0x164   : > { %v525_v43 = vpop.permute.xlu1 %524 }
 0x165   : > { %543 = vst.msk [vmem:[%s309_s17 + $0x14] sm:$0xf] %vm473_vm1, %v525_v43  ;;  %v485_v44 = vpop.permute.xlu0 %484 }
 0x166   : > { %507 = vst.msk [vmem:[%s299_s14 + $0x4] sm:$0xf] %vm473_vm1, %v485_v44 }
 0x168   : > { %v529_v45 = vpop.permute.xlu1 %528 }
 0x169   : > { %545 = vst.msk [vmem:[%s309_s17 + $0x1c] sm:$0xf] %vm473_vm1, %v529_v45  ;;  %v527_v46 = vpop.permute.xlu0 %526 }
 0x16a   : > { %544 = vst.msk [vmem:[%s309_s17 + $0x18] sm:$0xf] %vm473_vm1, %v527_v46 }
 0x16b PF: > { %s16_s20 = sadd.s32 1, %s855_s20   ;;  %s991_s18 = smov %s851_s19 }
 0x16c   : > { %p13_p5 = scmp.ge.s32.totalorder %s16_s20, 4   ;;  %s992_s19 = smov %s994_s21 }
 0x16e   :  { %15 = sbr.rel (!%p13_p5) target bundleno = 2 (0x2), region = 86 }

// kernel: vae_attention_block.3
= control target key start
LH: loop header
LB: loop body
LE: loop exit
PB: predicated region body
PF: predicated region fallthrough
CT: control target
= control target key end

     0   :  { %s1563_s21 = smov 0   ;;  %s1565_s22 = smov 0   ;;  %s1855_s0 = inlined_call_operand.vmem [shape: bf16[2,64,32], index: 0, kind: input, shape index: {}]   ;;  %s1856_s1 = inlined_call_operand.vmem [shape: bf16[2,64,32], index: 1, kind: input, shape index: {}]   ;;  %s1857_s2 = inlined_call_operand.vmem [shape: bf16[2,64,32], index: 2, kind: input, shape index: {}]   ;;  %s1858_s3 = inlined_call_operand.vmem [shape: bf16[32,32], index: 3, kind: input, shape index: {}]   ;;  %s1859_s4 = inlined_call_operand.vmem [shape: f32[32,1], index: 4, kind: input, shape index: {}]   ;;  %s1860_s5 = inlined_call_operand.vmem [shape: f32[2,32,64], index: 5, kind: input, shape index: {}]   ;;  %s1861_s6 = inlined_call_operand.vmem [shape: f32[2,32,64], index: 6, kind: output, shape index: {}]  }
   0x1   :  { %s1567_s23 = smov 0  }
   0x2 LB: > { %s35_s24 = sadd.s32 1, %s1519_s22  ;;  %p1294_p0 = scmp.ge.s32.totalorder %s1523_s23, 1  ;;  %s1523_s23 = sphi %s1567_s23, %s16_s23   ;;  %s1519_s22 = sphi %s1565_s22, %s1863_s22   ;;  %s1515_s21 = sphi %s1563_s21, %s1862_s21  }
   0x3   : > { %p37_p1 = scmp.ge.s32.totalorder %s35_s24, 2  ;;  %p289_p2 = scmp.lt.s32.totalorder %s1523_s23, 3 }
   0x5   : > { %s1865_s24 = smov (%p37_p1, %s35_s24), 0  ;;  %p290_p3 = pnand %p1294_p0, %p289_p2 }
   0x6   : > { %p353_p4 = scmp.lt.s32.totalorder (!%p290_p3), %s1515_s21, 1 }
   0x7   : > { %293 = sbr.rel (%p290_p3) target bundleno = 1077 (0x435), region = 44 }
   0xc   : > { %s1867_s21 = smov (!%p353_p4, %s1515_s21), 1  ;;  %vm420_vm0 = vcmask 261120   ;;  %vm403_vm1 = vcmask 7168   ;;  %v1525_v12 = vmov -inf   ;;  %vm583_vm2 = vcmask 523264  }
   0xd   : > { %s1581_s25 = sshll.u32 %s1867_s21, 5  ;;  %406 = vst.msk [vmem:[#allocation2 + $0x10] sm:$0xff] %vm403_vm1, %v1525_v12  ;;  %404 = vst.msk [vmem:[#allocation2] sm:$0xff] %vm403_vm1, %v1525_v12  ;;  %v1526_v25 = vmov 0   ;;  %v1527_v30 = vmov 0.0  }
   0xe   : > { %s370_s28 = scalar_lea.vmem %s1856_s1, %s1581_s25  ;;  %s360_s7 = scalar_lea.vmem %s1855_s0, %s1581_s25  ;;  %405 = vst.msk [vmem:[#allocation2 + $0x8] sm:$0xff] %vm403_vm1, %v1525_v12  ;;  %407 = vst.msk [vmem:[#allocation2 + $0x18] sm:$0xff] %vm403_vm1, %v1525_v12  ;;  %1438 = vset.pattern.permute.xlu1 %v1526_v25  ;;  %1437 = vset.pattern.permute.xlu0 %v1526_v25 }
   0xf   : > { %v1439_v0 = vld [vmem:[%s370_s28 + $0x18] sm:$0xff]   ;;  %v1440_v1 = vld [vmem:[%s370_s28 + $0x10] sm:$0xff]   ;;  %v1443_v3 = vld [vmem:[%s360_s7] sm:$0xff]   ;;  %408 = vst.msk [vmem:[#allocation2 + $0x20] sm:$0xff] %vm403_vm1, %v1525_v12  ;;  %s380_s10 = scalar_lea.vmem %s1857_s2, %s1581_s25  ;;  %s389_s29 = scalar_lea.vmem %s1860_s5, %s1581_s25 }
  0x10   : > { %1402 = vmatprep.subr.msk.bf16.mxu0 %vm420_vm0, %v1439_v0  ;;  %v508_v2 = vsel %vm420_vm0, %v1439_v0, 0  ;;  %1366 = vmatprep.mubr.msk.bf16.mxu0 %vm420_vm0, %v1443_v3  ;;  %v505_v4 = vsel %vm420_vm0, %v1440_v1, 0  ;;  %v1441_v5 = vld [vmem:[%s370_s28 + $0x8] sm:$0xff]   ;;  %v1442_v7 = vld [vmem:[%s370_s28] sm:$0xff]   ;;  %v1445_v10 = vld [vmem:[%s360_s7 + $0x10] sm:$0xff]   ;;  %409 = vst.msk [vmem:[#allocation2 + $0x28] sm:$0xff] %vm403_vm1, %v1525_v12  ;;  %s397_s8 = scalar_lea.vmem %s1861_s6, %s1581_s25 }
  0x11   : > { %1359 = vmatpush3.bf16.xpose.msra.mxu0 %v508_v2  ;;  %v502_v6 = vsel %vm420_vm0, %v1441_v5, 0  ;;  %v499_v8 = vsel %vm420_vm0, %v1442_v7, 0  ;;  %v1444_v9 = vld [vmem:[%s360_s7 + $0x8] sm:$0xff]   ;;  %v1446_v11 = vld [vmem:[%s360_s7 + $0x18] sm:$0xff]   ;;  %410 = vst.msk [vmem:[#allocation2 + $0x30] sm:$0xff] %vm403_vm1, %v1525_v12  ;;  %411 = vst.msk [vmem:[#allocation2 + $0x38] sm:$0xff] %vm403_vm1, %v1525_v12 }
  0x12   : > { %1403 = vmatprep.subr.msk.bf16.mxu0 %vm420_vm0, %v1440_v1  ;;  %418 = vst.msk [vmem:[#allocation3 + $0x30] sm:$0xff] %vm403_vm1, %v1527_v30  ;;  %412 = vst.msk [vmem:[#allocation3] sm:$0xff] %vm403_vm1, %v1527_v30  ;;  %v1447_v52 = vld [vmem:[%s380_s10 + $0x18] sm:$0xff]   ;;  %v1448_v58 = vld [vmem:[%s380_s10 + $0x10] sm:$0xff]  }
  0x13   : > { %413 = vst.msk [vmem:[#allocation3 + $0x8] sm:$0xff] %vm403_vm1, %v1527_v30  ;;  %414 = vst.msk [vmem:[#allocation3 + $0x10] sm:$0xff] %vm403_vm1, %v1527_v30  ;;  %1374 = vmatprep.subr.bf16.mxu1 %v1447_v52  ;;  %v1449_v0 = vld [vmem:[%s380_s10 + $0x8] sm:$0xff]   ;;  %v1450_v2 = vld [vmem:[%s380_s10] sm:$0xff]  }
  0x14   : > { %415 = vst.msk [vmem:[#allocation3 + $0x18] sm:$0xff] %vm403_vm1, %v1527_v30  ;;  %416 = vst.msk [vmem:[#allocation3 + $0x20] sm:$0xff] %vm403_vm1, %v1527_v30  ;;  %v1659_v31 = vld [vmem:[#allocation2 + $0x10] sm:$0xff]  ;;  %v1661_v33 = vld [vmem:[#allocation2] sm:$0xff]  ;;  %1375 = vmatpush3.bf16.msra.mxu1 %v1447_v52 }
  0x15   : > { %417 = vst.msk [vmem:[#allocation3 + $0x28] sm:$0xff] %vm403_vm1, %v1527_v30  ;;  %419 = vst.msk [vmem:[#allocation3 + $0x38] sm:$0xff] %vm403_vm1, %v1527_v30  ;;  %v1666_v36 = vld [vmem:[#allocation2 + $0x18] sm:$0xff]  ;;  %v1676_v40 = vld [vmem:[#allocation2 + $0x8] sm:$0xff]  ;;  %1376 = vmatprep.subr.bf16.mxu1 %v1448_v58 }
  0x16   : > { %421 = vst.msk [vmem:[#allocation4] sm:$0xff] %vm420_vm0, %v1527_v30  ;;  %422 = vst.msk [vmem:[#allocation4 + $0x8] sm:$0xff] %vm420_vm0, %v1527_v30  ;;  %v1694_v46 = vld [vmem:[#allocation2 + $0x20] sm:$0xff] }
  0x17   : > { %423 = vst.msk [vmem:[#allocation4 + $0x10] sm:$0xff] %vm420_vm0, %v1527_v30  ;;  %424 = vst.msk [vmem:[#allocation4 + $0x18] sm:$0xff] %vm420_vm0, %v1527_v30  ;;  %v1710_v51 = vld [vmem:[#allocation2 + $0x28] sm:$0xff] }
  0x18   : > { %425 = vst.msk [vmem:[#allocation4 + $0x20] sm:$0xff] %vm420_vm0, %v1527_v30  ;;  %426 = vst.msk [vmem:[#allocation4 + $0x28] sm:$0xff] %vm420_vm0, %v1527_v30  ;;  %v1700_v49 = vld [vmem:[#allocation2 + $0x30] sm:$0xff]  ;;  %v1722_v59 = vld [vmem:[#allocation2 + $0x38] sm:$0xff]  ;;  %1377 = vmatpush3.bf16.msra.mxu1 %v1448_v58 }
  0x19   : > { %1361 = vmatpush3.bf16.xpose.msra.mxu0 %v505_v4  ;;  %427 = vst.msk [vmem:[#allocation4 + $0x30] sm:$0xff] %vm420_vm0, %v1527_v30  ;;  %428 = vst.msk [vmem:[#allocation4 + $0x38] sm:$0xff] %vm420_vm0, %v1527_v30  ;;  %1378 = vmatprep.subr.bf16.mxu1 %v1449_v0 }
  0x1a   : > { %1404 = vmatprep.subr.msk.bf16.mxu0 %vm420_vm0, %v1441_v5 }
  0x1c   : > { %1379 = vmatpush3.bf16.msra.mxu1 %v1449_v0 }
  0x1d   : > { %1380 = vmatprep.subr.bf16.mxu1 %v1450_v2 }
  0x20   : > { %1381 = vmatpush3.bf16.msra.mxu1 %v1450_v2 }
  0x21   : > { %1363 = vmatpush3.bf16.xpose.msra.mxu0 %v502_v6 }
  0x22   : > { %1405 = vmatprep.subr.msk.bf16.mxu0 %vm420_vm0, %v1442_v7 }
  0x29   : > { %1365 = vmatpush3.bf16.xpose.msra.mxu0 %v499_v8 }
  0x30   : > { %1367 = vmatmul.mubr.msk.bf16.vlgmr.msra.gmra.mxu0 %vm420_vm0, %v1444_v9 }
  0x31   : > { %1370 = vmatprep.mubr.msk.bf16.mxu0 %vm420_vm0, %v1445_v10 }
  0x38   : > { %1371 = vmatmul.mubr.msk.bf16.gmra.mxu0 %vm420_vm0, %v1446_v11 }
  0xf0   : > { %v1611_v13 = vpop.f32.mrf.mxu0 }
  0xf1   : > { %v590_v14 = vsel %vm583_vm2, %v1611_v13, -inf }
  0xf2   : > { %591 = vmax.xlane.f32.xlu1 %v590_v14  ;;  %v1615_v15 = vpop.f32.mrf.mxu0 }
  0xf3   : > { %v584_v16 = vsel %vm583_vm2, %v1615_v15, -inf }
  0xf4   : > { %585 = vmax.xlane.f32.xlu0 %v584_v16  ;;  %v1619_v17 = vpop.f32.mrf.mxu0 }
  0xf5   : > { %v593_v18 = vsel %vm583_vm2, %v1619_v17, -inf }
  0xf6   : > { %594 = vmax.xlane.f32.xlu1 %v593_v18  ;;  %v1623_v19 = vpop.f32.mrf.mxu0 }
  0xf7   : > { %v587_v20 = vsel %vm583_vm2, %v1623_v19, -inf }
  0xf8   : > { %588 = vmax.xlane.f32.xlu0 %v587_v20  ;;  %v1627_v21 = vpop.f32.mrf.mxu0 }
  0xf9   : > { %v602_v27 = vsel %vm583_vm2, %v1627_v21, -inf }
  0xfa   : > { %v1629_v22 = vpop.f32.mrf.mxu0 }
  0xfb   : > { %v596_v23 = vsel %vm583_vm2, %v1629_v22, -inf }
  0xfc   : > { %597 = vmax.xlane.f32.xlu0 %v596_v23  ;;  %v1633_v24 = vpop.f32.mrf.mxu0 }
  0xfd   : > { %v605_v29 = vsel %vm583_vm2, %v1633_v24, -inf }
  0xfe   : > { %v1635_v26 = vpop.f32.mrf.mxu0 }
  0xff   : > { %v599_v28 = vsel %vm583_vm2, %v1635_v26, -inf }
 0x100   : > { %603 = vmax.xlane.f32.xlu0 %v602_v27  ;;  %600 = vmax.xlane.f32.xlu1 %v599_v28 }
 0x104   : > { %606 = vmax.xlane.f32.xlu1 %v605_v29 }
 0x17b   : > { %v592_v32 = vpop.xlane.xlu1 %591 }
 0x17c   : > { %v1664_v34 = vmax.f32 %v1659_v31, %v592_v32 }
 0x17d   : > { %v586_v35 = vpop.xlane.xlu0 %585 }
 0x17e   : > { %v618_v37 = vsub.f32 %v1659_v31, %v1664_v34  ;;  %948 = vst.msk [vmem:[#allocation2 + $0x10] sm:$0xff] %vm403_vm1, %v1664_v34  ;;  %v1673_v38 = vmax.f32 %v1661_v33, %v586_v35  ;;  %652 = vperm.xlu1 %1438, %v1664_v34  }
 0x17f   : > { %v595_v39 = vpop.xlane.xlu1 %594 }
 0x180   : > { %v616_v41 = vsub.f32 %v1661_v33, %v1673_v38  ;;  %946 = vst.msk [vmem:[#allocation2] sm:$0xff] %vm403_vm1, %v1673_v38  ;;  %v1683_v42 = vmax.f32 %v1666_v36, %v595_v39  ;;  %642 = vperm.xlu0 %1437, %v1673_v38   ;;  %v708_v38 = vld [vmem:[#allocation3 + $0x20] sm:$0xff] }
 0x181   : > { %v589_v43 = vpop.xlane.xlu0 %588 }
 0x182   : > { %v619_v44 = vsub.f32 %v1666_v36, %v1683_v42  ;;  %949 = vst.msk [vmem:[#allocation2 + $0x18] sm:$0xff] %vm403_vm1, %v1683_v42  ;;  %v1691_v45 = vmax.f32 %v1676_v40, %v589_v43  ;;  %657 = vperm.xlu1 %1438, %v1683_v42   ;;  %v624_v36 = vmul.f32 1.442695, %v616_v41  ;;  %v709_v42 = vld [vmem:[#allocation3 + $0x28] sm:$0xff] }
 0x183   : > { %v705_v41 = vld [vmem:[#allocation3 + $0x8] sm:$0xff] }
 0x184   : > { %v617_v47 = vsub.f32 %v1676_v40, %v1691_v45  ;;  %947 = vst.msk [vmem:[#allocation2 + $0x8] sm:$0xff] %vm403_vm1, %v1691_v45 }
 0x185   : > { %v598_v48 = vpop.xlane.xlu0 %597 }
 0x186   : > { %v1707_v50 = vmax.f32 %v1694_v46, %v598_v48  ;;  %647 = vperm.xlu1 %1438, %v1691_v45  }
 0x188   : > { %v620_v53 = vsub.f32 %v1694_v46, %v1707_v50  ;;  %950 = vst.msk [vmem:[#allocation2 + $0x20] sm:$0xff] %vm403_vm1, %v1707_v50 }
 0x189   : > { %v604_v54 = vpop.xlane.xlu0 %603  ;;  %v601_v55 = vpop.xlane.xlu1 %600 }
 0x18a   : > { %v1717_v56 = vmax.f32 %v1700_v49, %v604_v54  ;;  %v1720_v57 = vmax.f32 %v1710_v51, %v601_v55 }
 0x18c   : > { %v622_v60 = vsub.f32 %v1700_v49, %v1717_v56  ;;  %952 = vst.msk [vmem:[#allocation2 + $0x30] sm:$0xff] %vm403_vm1, %v1717_v56  ;;  %v621_v61 = vsub.f32 %v1710_v51, %v1720_v57  ;;  %951 = vst.msk [vmem:[#allocation2 + $0x28] sm:$0xff] %vm403_vm1, %v1720_v57  ;;  %672 = vperm.xlu1 %1438, %v1717_v56   ;;  %v626_v49 = vmul.f32 1.442695, %v617_v47  ;;  %v710_v56 = vld [vmem:[#allocation3 + $0x30] sm:$0xff]  ;;  %v711_v47 = vld [vmem:[#allocation3 + $0x38] sm:$0xff] }
 0x18d   : > { %v607_v62 = vpop.xlane.xlu1 %606  ;;  %v628_v51 = vmul.f32 1.442695, %v618_v37 }
 0x18e   : > { %v1734_v63 = vmax.f32 %v1722_v59, %v607_v62 }
 0x190   : > { %v623_v1 = vsub.f32 %v1722_v59, %v1734_v63  ;;  %953 = vst.msk [vmem:[#allocation2 + $0x38] sm:$0xff] %vm403_vm1, %v1734_v63  ;;  %662 = vperm.xlu1 %1438, %v1707_v50   ;;  %v636_v59 = vmul.f32 1.442695, %v622_v60 }
 0x194   : > { %667 = vperm.xlu1 %1438, %v1720_v57  }
 0x198   : > { %677 = vperm.xlu1 %1438, %v1734_v63  }
 0x1f9   : > { %v653_v3 = vpop.permute.xlu1 %652 }
 0x1fa   : > { %v682_v8 = vsub.f32 %v1611_v13, %v653_v3  ;;  %v638_v3 = vmul.f32 1.442695, %v623_v1  ;;  %v634_v1 = vmul.f32 1.442695, %v621_v61 }
 0x1fb   : > { %v643_v4 = vpop.permute.xlu0 %642 }
 0x1fc   : > { %v680_v5 = vsub.f32 %v1615_v15, %v643_v4  ;;  %v692_v14 = vmul.f32 1.442695, %v682_v8 }
 0x1fd   : > { %v658_v6 = vpop.permute.xlu1 %657 }
 0x1fe   : > { %v683_v7 = vsub.f32 %v1619_v17, %v658_v6  ;;  %v688_v9 = vmul.f32 1.442695, %v680_v5  ;;  %v632_v6 = vmul.f32 1.442695, %v620_v53 }
 0x200   : > { %v694_v10 = vmul.f32 1.442695, %v683_v7  ;;  %1453 = vpow2.f32 %v688_v9  ;;  %v630_v9 = vmul.f32 1.442695, %v619_v44 }
 0x201   : > { %v648_v11 = vpop.permute.xlu1 %647 }
 0x202   : > { %v681_v12 = vsub.f32 %v1623_v19, %v648_v11  ;;  %1455 = vpow2.f32 %v694_v10  ;;  %v707_v10 = vld [vmem:[#allocation3 + $0x18] sm:$0xff] }
 0x204   : > { %v690_v16 = vmul.f32 1.442695, %v681_v12 }
 0x206   : > { %1457 = vpow2.f32 %v690_v16 }
 0x207   : > { %1459 = vpow2.f32 %v692_v14  ;;  %v673_v18 = vpop.permute.xlu1 %672 }
 0x208   : > { %v686_v20 = vsub.f32 %v1627_v21, %v673_v18 }
 0x20a   : > { %v700_v15 = vmul.f32 1.442695, %v686_v20 }
 0x20b   : > { %v663_v23 = vpop.permute.xlu1 %662 }
 0x20c   : > { %1461 = vpow2.f32 %v700_v15  ;;  %v684_v17 = vsub.f32 %v1629_v22, %v663_v23 }
 0x20d   : > { %v1454_v28 = vpop.eup %1453 }
 0x20e   : > { %v696_v13 = vmul.f32 1.442695, %v684_v17  ;;  %v720_v8 = vsel %vm583_vm2, %v1454_v28, 0.0 }
 0x20f   : > { %v668_v25 = vpop.permute.xlu1 %667  ;;  %v1456_v19 = vpop.eup %1455 }
 0x210   : > { %v685_v27 = vsub.f32 %v1635_v26, %v668_v25  ;;  %1463 = vpow2.f32 %v696_v13  ;;  %v729_v62 = vsel %vm583_vm2, %v1456_v19, 0.0  ;;  %v706_v25 = vld [vmem:[#allocation3 + $0x10] sm:$0xff] }
 0x212   : > { %v698_v29 = vmul.f32 1.442695, %v685_v27 }
 0x213   : > { %v1458_v30 = vpop.eup %1457  ;;  %v678_v32 = vpop.permute.xlu1 %677 }
 0x214   : > { %v1460_v35 = vpop.eup %1459  ;;  %1465 = vpow2.f32 %v698_v29  ;;  %v687_v39 = vsub.f32 %v1633_v24, %v678_v32  ;;  %v817_v21 = vpack.c.bf16 %v1458_v30, %v1454_v28  ;;  %v723_v4 = vsel %vm583_vm2, %v1458_v30, 0.0  ;;  %v704_v32 = vld [vmem:[#allocation3] sm:$0xff] }
 0x215   : > { %v818_v43 = vpack.c.bf16 %v1456_v19, %v1460_v35  ;;  %v726_v7 = vsel %vm583_vm2, %v1460_v35, 0.0 }
 0x216   : > { %v702_v48 = vmul.f32 1.442695, %v687_v39  ;;  %1382 = vmatprep.mubr.msk.bf16.mxu1 %vm583_vm2, %v817_v21 }
 0x217   : > { %1383 = vmatmul.mubr.msk.bf16.vlgmr.msra.gmra.mxu1 %vm583_vm2, %v818_v43 }
 0x218   : > { %1467 = vpow2.f32 %v702_v48 }
 0x219   : > { %v1462_v22 = vpop.eup %1461  ;;  %1469 = vpow2.f32 %v638_v3 }
 0x21a   : > { %v738_v26 = vsel %vm583_vm2, %v1462_v22, 0.0  ;;  %1471 = vpow2.f32 %v632_v6 }
 0x21b   : > { %739 = vadd.xlane.f32.xlu1 %v738_v26  ;;  %1473 = vpow2.f32 %v636_v59 }
 0x21c   : > { %1475 = vpow2.f32 %v634_v1  ;;  %v1038_v1 = vld [vmem:[%s1859_s4 + $0x8] sm:$0xff] }
 0x21d   : > { %v1464_v52 = vpop.eup %1463  ;;  %1477 = vpow2.f32 %v630_v9  ;;  %v1451_v9 = vld [vmem:[%s1858_s3] sm:$0xff]  }
 0x21e   : > { %v732_v5 = vsel %vm583_vm2, %v1464_v52, 0.0  ;;  %1479 = vpow2.f32 %v626_v49  ;;  %v767_v49 = vld [vmem:[#allocation4 + $0x30] sm:$0xff] }
 0x21f   : > { %1481 = vpow2.f32 %v628_v51  ;;  %v765_v51 = vld [vmem:[#allocation4 + $0x20] sm:$0xff] }
 0x220   : > { %1483 = vpow2.f32 %v624_v36  ;;  %v768_v36 = vld [vmem:[#allocation4 + $0x38] sm:$0xff] }
 0x221   : > { %v1466_v54 = vpop.eup %1465 }
 0x222   : > { %v735_v55 = vsel %vm583_vm2, %v1466_v54, 0.0  ;;  %v819_v58 = vpack.c.bf16 %v1466_v54, %v1464_v52 }
 0x223   : > { %736 = vadd.xlane.f32.xlu1 %v735_v55 }
 0x224   : > { %1386 = vmatprep.mubr.msk.bf16.mxu1 %vm583_vm2, %v819_v58 }
 0x225   : > { %v1468_v24 = vpop.eup %1467 }
 0x226   : > { %v741_v0 = vsel %vm583_vm2, %v1468_v24, 0.0  ;;  %v820_v2 = vpack.c.bf16 %v1468_v24, %v1462_v22  ;;  %v1470_v63 = vpop.eup %1469 }
 0x227   : > { %730 = vadd.xlane.f32.xlu1 %v729_v62  ;;  %742 = vadd.xlane.f32.xlu0 %v741_v0  ;;  %v1472_v46 = vpop.eup %1471  ;;  %v719_v37 = vmul.f32 %v1470_v63, %v711_v47 }
 0x228   : > { %1387 = vmatmul.mubr.msk.bf16.gmra.mxu1 %vm583_vm2, %v820_v2  ;;  %v1474_v50 = vpop.eup %1473  ;;  %v716_v20 = vmul.f32 %v1472_v46, %v708_v38 }
 0x229   : > { %v1476_v53 = vpop.eup %1475  ;;  %v718_v57 = vmul.f32 %v1474_v50, %v710_v56  ;;  %1398 = vmatprep.mubr.msk.bf16.mxu1 %vm420_vm0, %v1451_v9 }
 0x22a   : > { %v717_v40 = vmul.f32 %v1476_v53, %v709_v42  ;;  %v1478_v44 = vpop.eup %1477 }
 0x22b   : > { %724 = vadd.xlane.f32.xlu1 %v723_v4  ;;  %733 = vadd.xlane.f32.xlu0 %v732_v5  ;;  %v715_v11 = vmul.f32 %v1478_v44, %v707_v10  ;;  %v1480_v12 = vpop.eup %1479 }
 0x22c   : > { %v713_v15 = vmul.f32 %v1480_v12, %v705_v41  ;;  %v1482_v23 = vpop.eup %1481  ;;  %v763_v41 = vld [vmem:[#allocation4 + $0x10] sm:$0xff] }
 0x22d   : > { %v714_v19 = vmul.f32 %v1482_v23, %v706_v25  ;;  %v1484_v29 = vpop.eup %1483 }
 0x22e   : > { %v712_v21 = vmul.f32 %v1484_v29, %v704_v32 }
 0x22f   : > { %727 = vadd.xlane.f32.xlu0 %v726_v7  ;;  %v1037_v7 = vld [vmem:[%s1859_s4] sm:$0xff] }
 0x233   : > { %721 = vadd.xlane.f32.xlu0 %v720_v8 }
 0x23c   : > { %806 = vperm.xlu1 %1438, %v1470_v63   ;;  %v1039_v63 = vld [vmem:[%s1859_s4 + $0x10] sm:$0xff] }
 0x240   : > { %791 = vperm.xlu1 %1438, %v1472_v46  }
 0x249   : > { %801 = vperm.xlu0 %1437, %v1474_v50  }
 0x24d   : > { %796 = vperm.xlu0 %1437, %v1476_v53   ;;  %v1040_v53 = vld [vmem:[%s1859_s4 + $0x18] sm:$0xff] }
 0x2a4   : > { %v740_v60 = vpop.xlane.xlu1 %739 }
 0x2a5   : > { %v750_v61 = vadd.f32 %v740_v60, %v718_v57 }
 0x2a7   : > { %759 = vst.msk [vmem:[#allocation3 + $0x30] sm:$0xff] %vm403_vm1, %v750_v61 }
 0x2ac   : > { %v737_v45 = vpop.xlane.xlu1 %736 }
 0x2ad   : > { %v749_v31 = vadd.f32 %v737_v45, %v717_v40  ;;  %v766_v45 = vld [vmem:[#allocation4 + $0x28] sm:$0xff] }
 0x2ae   : > { %v971_v34 = vld [vmem:[#allocation3 + $0x30] sm:$0xff] }
 0x2af   : > { %758 = vst.msk [vmem:[#allocation3 + $0x28] sm:$0xff] %vm403_vm1, %v749_v31  ;;  %1485 = vrcp.f32 %v971_v34 }
 0x2b0   : > { %v743_v14 = vpop.xlane.xlu0 %742  ;;  %v731_v33 = vpop.xlane.xlu1 %730 }
 0x2b1   : > { %v751_v16 = vadd.f32 %v743_v14, %v719_v37  ;;  %v747_v18 = vadd.f32 %v731_v33, %v715_v11 }
 0x2b3   : > { %760 = vst.msk [vmem:[#allocation3 + $0x38] sm:$0xff] %vm403_vm1, %v751_v16  ;;  %756 = vst.msk [vmem:[#allocation3 + $0x18] sm:$0xff] %vm403_vm1, %v747_v18 }
 0x2b4   : > { %v734_v17 = vpop.xlane.xlu0 %733  ;;  %v725_v13 = vpop.xlane.xlu1 %724 }
 0x2b5   : > { %v748_v27 = vadd.f32 %v734_v17, %v716_v20  ;;  %v745_v28 = vadd.f32 %v725_v13, %v713_v15 }
 0x2b6   : > { %v970_v52 = vld [vmem:[#allocation3 + $0x28] sm:$0xff] }
 0x2b7   : > { %757 = vst.msk [vmem:[#allocation3 + $0x20] sm:$0xff] %vm403_vm1, %v748_v27  ;;  %754 = vst.msk [vmem:[#allocation3 + $0x8] sm:$0xff] %vm403_vm1, %v745_v28  ;;  %v764_v27 = vld [vmem:[#allocation4 + $0x18] sm:$0xff] }
 0x2b8   : > { %v728_v30 = vpop.xlane.xlu0 %727  ;;  %v807_v46 = vpop.permute.xlu1 %806 }
 0x2b9   : > { %v746_v35 = vadd.f32 %v728_v30, %v714_v19  ;;  %v816_v31 = vmul.f32 %v807_v46, %v768_v36 }
 0x2ba   : > { %v972_v39 = vld [vmem:[#allocation3 + $0x38] sm:$0xff] }
 0x2bb   : > { %755 = vst.msk [vmem:[#allocation3 + $0x10] sm:$0xff] %vm403_vm1, %v746_v35  ;;  %1487 = vrcp.f32 %v972_v39  ;;  %v968_v55 = vld [vmem:[#allocation3 + $0x18] sm:$0xff]  ;;  %v761_v35 = vld [vmem:[#allocation4] sm:$0xff] }
 0x2bc   : > { %v1486_v43 = vpop.eup %1485  ;;  %v722_v48 = vpop.xlane.xlu0 %721 }
 0x2bd   : > { %v744_v22 = vadd.f32 %v722_v48, %v712_v21  ;;  %1013 = vperm.xlu1 %1438, %v1486_v43   ;;  %v792_v57 = vpop.permute.xlu1 %791 }
 0x2be   : > { %v969_v26 = vld [vmem:[#allocation3 + $0x20] sm:$0xff]  ;;  %v966_v0 = vld [vmem:[#allocation3 + $0x8] sm:$0xff]  ;;  %v813_v40 = vmul.f32 %v792_v57, %v765_v51 }
 0x2bf   : > { %753 = vst.msk [vmem:[#allocation3] sm:$0xff] %vm403_vm1, %v744_v22  ;;  %1489 = vrcp.f32 %v969_v26 }
 0x2c0   : > { %1491 = vrcp.f32 %v970_v52 }
 0x2c1   : > { %781 = vperm.xlu1 %1438, %v1482_v23  }
 0x2c2   : > { %v967_v54 = vld [vmem:[#allocation3 + $0x10] sm:$0xff] }
 0x2c3   : > { %1493 = vrcp.f32 %v967_v54 }
 0x2c4   : > { %1495 = vrcp.f32 %v968_v55  ;;  %v802_v56 = vpop.permute.xlu0 %801  ;;  %v762_v55 = vld [vmem:[#allocation4 + $0x8] sm:$0xff] }
 0x2c5   : > { %v815_v61 = vmul.f32 %v802_v56, %v767_v49 }
 0x2c6   : > { %v965_v24 = vld [vmem:[#allocation3] sm:$0xff] }
 0x2c7   : > { %1497 = vrcp.f32 %v965_v24 }
 0x2c8   : > { %v1488_v58 = vpop.eup %1487  ;;  %1499 = vrcp.f32 %v966_v0  ;;  %v797_v47 = vpop.permute.xlu0 %796 }
 0x2c9   : > { %1018 = vperm.xlu0 %1437, %v1488_v58   ;;  %v814_v11 = vmul.f32 %v797_v47, %v766_v45 }
 0x2cc   : > { %v1490_v62 = vpop.eup %1489 }
 0x2cd   : > { %786 = vperm.xlu0 %1437, %v1478_v44   ;;  %1003 = vperm.xlu1 %1438, %v1490_v62   ;;  %v1492_v2 = vpop.eup %1491 }
 0x2d0   : > { %v1494_v3 = vpop.eup %1493 }
 0x2d1   : > { %771 = vperm.xlu1 %1438, %v1484_v29   ;;  %1008 = vperm.xlu0 %1437, %v1492_v2   ;;  %v1496_v4 = vpop.eup %1495 }
 0x2d4   : > { %v1498_v5 = vpop.eup %1497 }
 0x2d5   : > { %993 = vperm.xlu1 %1438, %v1494_v3   ;;  %776 = vperm.xlu0 %1437, %v1480_v12   ;;  %v1500_v8 = vpop.eup %1499 }
 0x2d7   : > { %v1384_v6 = vpop.f32.mrf.mxu1 }
 0x2d9   : > { %983 = vperm.xlu1 %1438, %v1498_v5   ;;  %998 = vperm.xlu0 %1437, %v1496_v4   ;;  %v1798_v59 = vpop.f32.mrf.mxu1 }
 0x2db   : > { %v1385_v50 = vpop.f32.mrf.mxu1 }
 0x2dd   : > { %1043 = vperm.xlu1 %1438, %v1037_v7   ;;  %988 = vperm.xlu0 %1437, %v1500_v8   ;;  %v902_v60 = vpop.f32.mrf.mxu1 }
 0x2e1   : > { %1053 = vperm.xlu1 %1438, %v1039_v63   ;;  %1048 = vperm.xlu0 %1437, %v1038_v1  }
 0x2e5   : > { %1058 = vperm.xlu0 %1437, %v1040_v53  }
 0x2e8   : > { %v1388_v42 = vpop.f32.mrf.mxu1 }
 0x2e9   : > { %v936_v44 = vadd.f32 %v1388_v42, %v815_v61 }
 0x2ea   : > { %v915_v10 = vpop.f32.mrf.mxu1 }
 0x2eb   : > { %944 = vst.msk [vmem:[#allocation4 + $0x30] sm:$0xff] %vm420_vm0, %v936_v44  ;;  %v934_v34 = vadd.f32 %v915_v10, %v813_v40  ;;  %v1140_v44 = vld [vmem:[%s389_s29 + $0x10] sm:$0xff]  ;;  %v1138_v10 = vld [vmem:[%s389_s29] sm:$0xff] }
 0x2ec   : > { %v1389_v37 = vpop.f32.mrf.mxu1 }
 0x2ed   : > { %942 = vst.msk [vmem:[#allocation4 + $0x20] sm:$0xff] %vm420_vm0, %v934_v34  ;;  %v937_v12 = vadd.f32 %v1389_v37, %v816_v31 }
 0x2ee   : > { %v918_v14 = vpop.f32.mrf.mxu1 }
 0x2ef   : > { %945 = vst.msk [vmem:[#allocation4 + $0x38] sm:$0xff] %vm420_vm0, %v937_v12  ;;  %v935_v33 = vadd.f32 %v918_v14, %v814_v11  ;;  %v1141_v12 = vld [vmem:[%s389_s29 + $0x18] sm:$0xff] }
 0x2f1   : > { %943 = vst.msk [vmem:[#allocation4 + $0x28] sm:$0xff] %vm420_vm0, %v935_v33 }
 0x2f2   : > { %v963_v15 = vld [vmem:[#allocation4 + $0x30] sm:$0xff] }
 0x2f4   : > { %v961_v21 = vld [vmem:[#allocation4 + $0x20] sm:$0xff] }
 0x2f6   : > { %v964_v17 = vld [vmem:[#allocation4 + $0x38] sm:$0xff] }
 0x2f8   : > { %v962_v43 = vld [vmem:[#allocation4 + $0x28] sm:$0xff] }
 0x338   : > { %v1014_v38 = vpop.permute.xlu1 %1013 }
 0x339   : > { %v1027_v13 = vmul.f32 %v1014_v38, %v963_v15 }
 0x33c   : > { %v782_v16 = vpop.permute.xlu1 %781 }
 0x33d   : > { %v811_v18 = vmul.f32 %v782_v16, %v763_v41  ;;  %v1139_v41 = vld [vmem:[%s389_s29 + $0x8] sm:$0xff] }
 0x33f   : > { %v932_v20 = vadd.f32 %v1384_v6, %v811_v18 }
 0x341   : > { %940 = vst.msk [vmem:[#allocation4 + $0x10] sm:$0xff] %vm420_vm0, %v932_v20 }
 0x344   : > { %v1019_v23 = vpop.permute.xlu0 %1018 }
 0x345   : > { %v1028_v25 = vmul.f32 %v1019_v23, %v964_v17 }
 0x347   : > { %v1036_v28 = vpack.c.bf16 %v1028_v25, %v1027_v13 }
 0x348   : > { %v787_v19 = vpop.permute.xlu0 %786  ;;  %v1004_v29 = vpop.permute.xlu1 %1003  ;;  %v959_v5 = vld [vmem:[#allocation4 + $0x10] sm:$0xff] }
 0x349   : > { %v812_v30 = vmul.f32 %v787_v19, %v764_v27  ;;  %1406 = vmatprep.subr.msk.bf16.mxu1 %vm420_vm0, %v1036_v28  ;;  %v1087_v32 = vsel %vm420_vm0, %v1036_v28, 0  ;;  %v1025_v26 = vmul.f32 %v1004_v29, %v961_v21 }
 0x34a   : > { %1391 = vmatpush3.bf16.xpose.msra.mxu1 %v1087_v32 }
 0x34b   : > { %v933_v39 = vadd.f32 %v1385_v50, %v812_v30 }
 0x34c   : > { %v1009_v48 = vpop.permute.xlu0 %1008  ;;  %v772_v22 = vpop.permute.xlu1 %771 }
 0x34d   : > { %941 = vst.msk [vmem:[#allocation4 + $0x18] sm:$0xff] %vm420_vm0, %v933_v39  ;;  %v1026_v52 = vmul.f32 %v1009_v48, %v962_v43  ;;  %v809_v54 = vmul.f32 %v772_v22, %v761_v35 }
 0x34f   : > { %v1035_v58 = vpack.c.bf16 %v1026_v52, %v1025_v26  ;;  %v930_v24 = vadd.f32 %v1798_v59, %v809_v54 }
 0x350   : > { %v777_v62 = vpop.permute.xlu0 %776  ;;  %v994_v3 = vpop.permute.xlu1 %993 }
 0x351   : > { %938 = vst.msk [vmem:[#allocation4] sm:$0xff] %vm420_vm0, %v930_v24  ;;  %v810_v0 = vmul.f32 %v777_v62, %v762_v55  ;;  %1407 = vmatprep.subr.msk.bf16.mxu1 %vm420_vm0, %v1035_v58  ;;  %v1084_v2 = vsel %vm420_vm0, %v1035_v58, 0  ;;  %v1023_v8 = vmul.f32 %v994_v3, %v959_v5 }
 0x352   : > { %1393 = vmatpush3.bf16.xpose.msra.mxu1 %v1084_v2 }
 0x353   : > { %v931_v4 = vadd.f32 %v902_v60, %v810_v0  ;;  %v1452_v60 = vld [vmem:[%s1858_s3 + $0x8] sm:$0xff]  }
 0x354   : > { %v960_v6 = vld [vmem:[#allocation4 + $0x18] sm:$0xff]  ;;  %v999_v7 = vpop.permute.xlu0 %998  ;;  %v984_v50 = vpop.permute.xlu1 %983 }
 0x355   : > { %939 = vst.msk [vmem:[#allocation4 + $0x8] sm:$0xff] %vm420_vm0, %v931_v4  ;;  %v1024_v63 = vmul.f32 %v999_v7, %v960_v6 }
 0x357   : > { %v1034_v1 = vpack.c.bf16 %v1024_v63, %v1023_v8 }
 0x358   : > { %v957_v46 = vld [vmem:[#allocation4] sm:$0xff]  ;;  %v989_v9 = vpop.permute.xlu0 %988  ;;  %v1044_v61 = vpop.permute.xlu1 %1043 }
 0x359   : > { %1408 = vmatprep.subr.msk.bf16.mxu1 %vm420_vm0, %v1034_v1  ;;  %v1081_v59 = vsel %vm420_vm0, %v1034_v1, 0  ;;  %v1021_v49 = vmul.f32 %v984_v50, %v957_v46 }
 0x35a   : > { %1395 = vmatpush3.bf16.xpose.msra.mxu1 %v1081_v59 }
 0x35c   : > { %v958_v53 = vld [vmem:[#allocation4 + $0x8] sm:$0xff]  ;;  %v1049_v36 = vpop.permute.xlu0 %1048  ;;  %v1054_v42 = vpop.permute.xlu1 %1053 }
 0x35d   : > { %v1022_v56 = vmul.f32 %v989_v9, %v958_v53 }
 0x35f   : > { %v1033_v51 = vpack.c.bf16 %v1022_v56, %v1021_v49 }
 0x360   : > { %v1059_v37 = vpop.permute.xlu0 %1058 }
 0x361   : > { %1409 = vmatprep.subr.msk.bf16.mxu1 %vm420_vm0, %v1033_v51  ;;  %v1078_v57 = vsel %vm420_vm0, %v1033_v51, 0 }
 0x362   : > { %1397 = vmatpush3.bf16.xpose.msra.mxu1 %v1078_v57 }
 0x369   : > { %1399 = vmatmul.mubr.msk.bf16.vlgmr.msra.gmra.mxu1 %vm420_vm0, %v1452_v60 }
 0x429   : > { %v1400_v40 = vpop.f32.mrf.mxu1 }
 0x42a   : > { %v1132_v45 = vadd.f32 %v1400_v40, %v1054_v42 }
 0x42b   : > { %v1123_v47 = vpop.f32.mrf.mxu1 }
 0x42c   : > { %v1144_v31 = vadd.f32 %v1140_v44, %v1132_v45  ;;  %v1124_v34 = vadd.f32 %v1123_v47, %v1044_v61 }
 0x42d   : > { %v1401_v11 = vpop.f32.mrf.mxu1 }
 0x42e   : > { %1148 = vst.msk [vmem:[%s397_s8 + $0x10] sm:$0xff] %vm583_vm2, %v1144_v31  ;;  %v1142_v14 = vadd.f32 %v1138_v10, %v1124_v34  ;;  %v1135_v33 = vadd.f32 %v1401_v11, %v1059_v37 }
 0x42f   : > { %v1126_v38 = vpop.f32.mrf.mxu1 }
 0x430   : > { %1146 = vst.msk [vmem:[%s397_s8] sm:$0xff] %vm583_vm2, %v1142_v14  ;;  %v1145_v16 = vadd.f32 %v1141_v12, %v1135_v33  ;;  %v1127_v18 = vadd.f32 %v1126_v38, %v1049_v36 }
 0x432   : > { %1149 = vst.msk [vmem:[%s397_s8 + $0x18] sm:$0xff] %vm583_vm2, %v1145_v16  ;;  %v1143_v20 = vadd.f32 %v1139_v41, %v1127_v18 }
 0x434   : > { %1147 = vst.msk [vmem:[%s397_s8 + $0x8] sm:$0xff] %vm583_vm2, %v1143_v20 }
 0x435 PF: > { %s16_s23 = sadd.s32 1, %s1523_s23   ;;  %s1862_s21 = smov %s1519_s22 }
 0x436   : > { %p13_p5 = scmp.ge.s32.totalorder %s16_s23, 4   ;;  %s1863_s22 = smov %s1865_s24 }
 0x438   :  { %15 = sbr.rel (!%p13_p5) target bundleno = 2 (0x2), region = 91 }

</bundles_post_ra>
